<compile_context>
chip_gen: v6e
topology: v6e:2x2x1
jax: 0.10.0
libtpu: 0.0.40
codegen_flags: <defaults>
</compile_context>

<pallas_src>
import jax
import jax.numpy as jnp
import numpy as np
from jax.experimental import pallas as pl
from jax.experimental.pallas import tpu as pltpu


def _gcl_pre_kernel(feat_ref, fc_ref, attn_ref, o_ref):
    # f_input = relu(features @ FC[:, tile])          (MXU + VPU)
    f_input = jnp.maximum(
        jnp.dot(feat_ref[...], fc_ref[...], preferred_element_type=jnp.float32),
        0.0,
    )

    # Row-wise softmax of the (17, 17) learned attention matrix.
    logits = attn_ref[...]
    m = jnp.max(logits, axis=1, keepdims=True)
    p = jnp.exp(logits - m)
    denom = jnp.sum(p, axis=1, keepdims=True)
    # approx=False: the denominator is a single 17-element column per step, so
    # the exact reciprocal is free and keeps the 1e-5 comparison tolerance.
    attn = p * pl.reciprocal(denom, approx=False)

    # h_prime = attn @ f_input                        (MXU), lane-dense store
    o_ref[...] = jnp.dot(
        attn, f_input, preferred_element_type=jnp.float32
    ).astype(o_ref.dtype)


def graph_correlation_layer_pre(features, coordinates, adj, FC, attention_param):
    """Pallas implementation of GraphCorrelationLayer_pre.forward.

    `coordinates` and `adj` are unused by the reference PyTorch forward; they
    are accepted only to mirror its signature.
    """
    del coordinates, adj  # unused by the original forward as well
    N, in_features = features.shape
    assert FC.shape[0] == in_features
    out_features = FC.shape[1]
    assert attention_param.shape == (N, N), (
        "torch.matmul(attention, f_input) requires N == attention.shape[0] (17)"
    )

    # Lane-dense 128-wide column tiles of the output when Fout allows it;
    # otherwise fall back to a single full-width block (still correct).
    tf = 128 if (out_features % 128 == 0) else out_features
    grid = (out_features // tf,)

    return pl.pallas_call(
        _gcl_pre_kernel,
        out_shape=jax.ShapeDtypeStruct((N, out_features), jnp.float32),
        grid=grid,
        in_specs=[
            pl.BlockSpec((N, in_features), lambda j: (0, 0)),   # features (resident)
            pl.BlockSpec((in_features, tf), lambda j: (0, j)),  # FC column tile
            pl.BlockSpec((N, N), lambda j: (0, 0)),             # attention logits
        ],
        out_specs=pl.BlockSpec((N, tf), lambda j: (0, j)),
        compiler_params=pltpu.CompilerParams(
            # Output column tiles are independent -> megacore-parallel on v7x.
            dimension_semantics=("parallel",),
            # Tiny working set; modest explicit limit leaves headroom on 64 MiB v7x.
            vmem_limit_bytes=16 << 20,
        ),
    )(features, FC, attention_param)


def _xavier_uniform(key, shape, gain):
    fan_in, fan_out = shape[0], shape[1]
    bound = gain * np.sqrt(6.0 / (fan_in + fan_out))
    return jax.random.uniform(
        key, shape, dtype=jnp.float32, minval=-bound, maxval=bound
    )


def _reference(features, FC, attention_param):
    # Pure-JAX mirror of the PyTorch forward.
    f_input = jax.nn.relu(features @ FC)
    attn = jax.nn.softmax(attention_param, axis=1)
    return attn @ f_input


if __name__ == "__main__":
    N = 17                 # fixed by the (17, 17) attention parameter in the module
    in_features = 64
    out_features = 256     # matches self.f_out; lane-dense (2 x 128-wide tiles)

    key = jax.random.PRNGKey(0)
    kf, kc, kw = jax.random.split(key, 3)

    features = jax.random.normal(kf, (N, in_features), dtype=jnp.float32)
    coordinates = jax.random.normal(kc, (N, 3), dtype=jnp.float32)  # unused in forward
    adj = jnp.ones((N, N), dtype=jnp.float32)                       # unused in forward

    FC = _xavier_uniform(kw, (in_features, out_features), gain=1.414)
    # nn.Parameter(torch.zeros(17,17) - 1 + torch.eye(17,17) * 2)
    attention_param = (
        jnp.zeros((17, 17), dtype=jnp.float32) - 1.0
        + 2.0 * jnp.eye(17, dtype=jnp.float32)
    )

    out = graph_correlation_layer_pre(features, coordinates, adj, FC, attention_param)
    out = jax.block_until_ready(out)

    ref = _reference(features, FC, attention_param)
    np.testing.assert_allclose(np.asarray(out), np.asarray(ref), rtol=1e-5, atol=1e-5)

    print("KERNEL_OK")
</pallas_src>

<mosaic_0001>
module attributes {stable_mosaic.version = 11 : i64} {
  func.func @_gcl_pre_kernel(%arg0: i32, %arg1: memref<17x64xf32, #tpu.memory_space<vmem>>, %arg2: memref<64x128xf32, #tpu.memory_space<vmem>>, %arg3: memref<17x17xf32, #tpu.memory_space<vmem>>, %arg4: memref<17x128xf32, #tpu.memory_space<vmem>>) attributes {dimension_semantics = [#tpu.dimension_semantics<parallel>], iteration_bounds = array<i64: 2>, scalar_prefetch = 0 : i64, scratch_operands = 0 : i64, tpu.core_type = #tpu.core_type<tc>, window_params = [{pipeline_mode = #tpu.pipeline_mode<synchronous>, transform_indices = @transform_0, window_bounds = array<i64: 17, 64>}, {transform_indices = @transform_1, window_bounds = array<i64: 64, 128>}, {pipeline_mode = #tpu.pipeline_mode<synchronous>, transform_indices = @transform_2, window_bounds = array<i64: 17, 17>}, {transform_indices = @transform_3, window_bounds = array<i64: 17, 128>}]} {
    %c0 = arith.constant 0 : index
    %c0_0 = arith.constant 0 : index
    %0 = vector.load %arg1[%c0, %c0_0] : memref<17x64xf32, #tpu.memory_space<vmem>>, vector<17x64xf32>
    %c0_1 = arith.constant 0 : index
    %c0_2 = arith.constant 0 : index
    %1 = vector.load %arg2[%c0_1, %c0_2] : memref<64x128xf32, #tpu.memory_space<vmem>>, vector<64x128xf32>
    %cst = arith.constant dense<0.000000e+00> : vector<17x128xf32>
    %2 = tpu.matmul %0, %1, %cst {dimension_numbers = #tpu.dot_dimension_numbers<[1], [0], [0], [1], [0, 0, 1, 1], [], []>} : vector<17x64xf32>, vector<64x128xf32>, vector<17x128xf32> -> vector<17x128xf32>
    %cst_3 = arith.constant 0.000000e+00 : f32
    %3 = vector.broadcast %cst_3 : f32 to vector<17x128xf32>
    %4 = arith.maximumf %2, %3 : vector<17x128xf32>
    %c0_4 = arith.constant 0 : index
    %c0_5 = arith.constant 0 : index
    %5 = vector.load %arg3[%c0_4, %c0_5] : memref<17x17xf32, #tpu.memory_space<vmem>>, vector<17x17xf32>
    %cst_6 = arith.constant dense<0xFF800000> : vector<17xf32>
    %6 = vector.multi_reduction <maximumf>, %5, %cst_6 [1] : vector<17x17xf32> to vector<17xf32>
    %7 = vector.shape_cast %6 : vector<17xf32> to vector<17x1xf32>
    %8 = vector.broadcast %7 : vector<17x1xf32> to vector<17x17xf32>
    %9 = arith.subf %5, %8 : vector<17x17xf32>
    %10 = math.exp %9 : vector<17x17xf32>
    %cst_7 = arith.constant dense<0.000000e+00> : vector<17xf32>
    %11 = vector.multi_reduction <add>, %10, %cst_7 [1] : vector<17x17xf32> to vector<17xf32>
    %12 = vector.shape_cast %11 : vector<17xf32> to vector<17x1xf32>
    %13 = tpu.reciprocal %12 : vector<17x1xf32> -> vector<17x1xf32>
    %14 = vector.broadcast %13 : vector<17x1xf32> to vector<17x17xf32>
    %15 = arith.mulf %10, %14 : vector<17x17xf32>
    %cst_8 = arith.constant dense<0.000000e+00> : vector<17x128xf32>
    %16 = tpu.matmul %15, %4, %cst_8 {dimension_numbers = #tpu.dot_dimension_numbers<[1], [0], [0], [1], [0, 0, 1, 1], [], []>} : vector<17x17xf32>, vector<17x128xf32>, vector<17x128xf32> -> vector<17x128xf32>
    %c0_9 = arith.constant 0 : index
    %c0_10 = arith.constant 0 : index
    %17 = vector.load %arg4[%c0_9, %c0_10] : memref<17x128xf32, #tpu.memory_space<vmem>>, vector<17x128xf32>
    tpu.vector_store %arg4[%c0_9, %c0_10], %16 {strides = array<i32>} : memref<17x128xf32, #tpu.memory_space<vmem>>, vector<17x128xf32>,
    return
  }
  func.func @transform_0(%arg0: i32) -> (i32, i32) {
    %c0_i32 = arith.constant 0 : i32
    %c0_i32_0 = arith.constant 0 : i32
    %c0_i32_1 = arith.constant 0 : i32
    return %c0_i32, %c0_i32_0 : i32, i32
  }
  func.func @transform_1(%arg0: i32) -> (i32, i32) {
    %c0_i32 = arith.constant 0 : i32
    %c0_i32_0 = arith.constant 0 : i32
    return %c0_i32, %arg0 : i32, i32
  }
  func.func @transform_2(%arg0: i32) -> (i32, i32) {
    %c0_i32 = arith.constant 0 : i32
    %c0_i32_0 = arith.constant 0 : i32
    %c0_i32_1 = arith.constant 0 : i32
    return %c0_i32, %c0_i32_0 : i32, i32
  }
  func.func @transform_3(%arg0: i32) -> (i32, i32) {
    %c0_i32 = arith.constant 0 : i32
    %c0_i32_0 = arith.constant 0 : i32
    return %c0_i32, %arg0 : i32, i32
  }
}

</mosaic_0001>

<bundles_post_ra>
// kernel: tpu_custom_call.1
= control target key start
LH: loop header
LB: loop body
LE: loop exit
PB: predicated region body
PF: predicated region fallthrough
CT: control target
= control target key end

     0   :  { %8 = vsyncpa [#allocation3], 0  ;;  %s1164_s0 = inlined_call_operand.hbm [shape: f32[17,64], index: 0, kind: input, shape index: {}]   ;;  %s1165_s1 = inlined_call_operand.hbm [shape: f32[64,256], index: 1, kind: input, shape index: {}]   ;;  %s1166_s2 = inlined_call_operand.hbm [shape: f32[17,17], index: 2, kind: input, shape index: {}]   ;;  %s1167_s3 = inlined_call_operand.hbm [shape: f32[17,256], index: 3, kind: output, shape index: {}]  }
   0x1   :  { %9 = vsyncpa [#allocation6], 0 }
   0x2   :  { %11 = vsyncpa [#allocation6 + $0x1], 0 }
   0x3   :  { %12 = vsyncpa [#allocation4], 0 }
   0x4   :  { %14 = vsyncpa [#allocation4 + $0x1], 0  ;;  %s914_s12 = smov 0   ;;  %s916_s13 = smov 0  }
   0x5   :  { %s918_s14 = smov 0   ;;  %s920_s15 = smov 0  }
   0x6 LB: > { %s935_s16 = sadd.s32 4294967295, %s880_s15   ;;  %s562_s17 = sadd.s32 4294967294, %s880_s15   ;;  %s880_s15 = sphi %s920_s15, %s1191_s15   ;;  %s876_s14 = sphi %s918_s14, %s1190_s14   ;;  %s872_s13 = sphi %s916_s13, %s1189_s13   ;;  %s868_s12 = sphi %s914_s12, %s1188_s12  }
   0x7   : > { %s939_s18 = sadd.s32 1, %s880_s15   ;;  %s48_s19 = sadd.s32 1, %s876_s14 }
   0x8   : > { %s45_s20 = ssub.s32 %s880_s15, %s939_s18  ;;  %p55_p0 = scmp.ne.s32.totalorder %s876_s14, %s872_s13 }
   0x9   : > { %p46_p1 = scmp.eq.s32.totalorder %s45_s20, 0  ;;  %p56_p2 = scmp.eq.s32.totalorder %s880_s15, 0 }
   0xa   : > { %p61_p3 = scmp.ne.s32.totalorder %s872_s13, %s868_s12  ;;  %p1169_p4 = scmp.eq.s32.totalorder %s935_s16, 0 }
   0xb   : > { %s951_s21 = scalar_select %p46_p1, %s876_s14, %s48_s19  }
   0xc   : > { %p953_p5 = por %p56_p2, %p55_p0  ;;  %p959_p6 = por %p1169_p4, %p61_p3 }
   0xd   : > { %p106_p7 = scmp.eq.s32.totalorder %s935_s16, 1  ;;  %p112_p8 = scmp.eq.s32.totalorder %s562_s17, 1 }
   0xe   : > { %s1173_s23 = scalar_select %p959_p6, 1, 0 }
   0xf   : > { %p563_p9 = scmp.ge.s32.totalorder %s880_s15, 1  ;;  %p119_p10 = scmp.lt.s32.totalorder %s880_s15, 3 }
  0x10   : > { %p966_p11 = por %p106_p7, %p55_p0  ;;  %p970_p12 = por %p112_p8, %p61_p3 }
  0x11   : > { %p974_p13 = pnand %p563_p9, %p119_p10  ;;  %s882_s27 = smov [#allocation7]  }
  0x12   : > { %s1174_s24 = scalar_select %p966_p11, 1, 0 }
  0x13   : > { %s1175_s25 = scalar_select %p970_p12, 1, 0 }
  0x14   : > { %s1176_s26 = scalar_select %p974_p13, 1, 0 }
  0x15   : > { %p653_p1 = pneg %p974_p13  ;;  %s144_s28 = sshll.u32 %s882_s27, 4  ;;  %s145_s28 = int_to_ptr.vmem [resolvable:$true] %s144_s28 }
  0x16   : > { %p670_p0 = scmp.lt.s32.totalorder %s880_s15, 2  ;;  %s883_s30 = smov [#allocation2]  }
  0x17   : > { %p983_p6 = pnand %p653_p1, %p1169_p4  ;;  %s131_s4 = sshll.u32 %s883_s30, 4  ;;  %s132_s4 = int_to_ptr.vmem [resolvable:$true] %s131_s4 }
  0x18   : > { %s739_s5 = scalar_lea.vmem %s145_s28, 384  ;;  %p747_p10 = scmp.lt.s32.totalorder %s145_s28, %s145_s28 }
  0x19   : > { %p730_p3 = pneg %p983_p6  ;;  %p740_p7 = scmp.ne.s32.totalorder %s145_s28, %s739_s5 }
  0x1a   : > { %p748_p2 = scmp.lt.s32.totalorder %s739_s5, %s739_s5 }
  0x1b   : > { %p742_p8 = pnand %p740_p7, %p730_p3 }
  0x1c   : > { %p749_p1 = por %p748_p2, %p747_p10 }
  0x1d   : > { %p743_p9 = pneg %p742_p8 }
  0x1f   : > { %p750_p4 = pnand %p749_p1, %p743_p9 }
  0x21   : > { %753 = shalt.err (!%p750_p4)
}
  0x22   : > { %s884_s6 = smov 128   ;;  %s885_s7 = smov 8  }
  0x23   : > { %659 = dma.hbm_to_vmem [thread:$0]  (!%p983_p6), %s1166_s2, 384, %s145_s28, [#allocation6], %s884_s6, %s884_s6, %s885_s7  }
  0x24   : > { %p1005_p7 = pnand %p670_p0, %p953_p5  ;;  %s765_s11 = scalar_lea.vmem %s132_s4, 384 }
  0x25   : > { %p766_p4 = scmp.ne.s32.totalorder %s132_s4, %s765_s11  ;;  %p773_p9 = scmp.lt.s32.totalorder %s132_s4, %s132_s4 }
  0x26   : > { %p774_p10 = scmp.lt.s32.totalorder %s765_s11, %s765_s11 }
  0x27   : > { %p768_p2 = pnand %p766_p4, %p730_p3 }
  0x28   : > { %p775_p1 = por %p774_p10, %p773_p9 }
  0x29   : > { %p769_p8 = pneg %p768_p2 }
  0x2b   : > { %p776_p12 = pnand %p775_p1, %p769_p8 }
  0x2d   : > { %779 = shalt.err (!%p776_p12)
}
  0x2e   : > { %656 = dma.hbm_to_vmem [thread:$0]  (!%p983_p6), %s1164_s0, 384, %s132_s4, [#allocation3], %s884_s6, %s884_s6, %s885_s7  }
  0x2f   : > { %s158_s20 = sand.u32 1, %s880_s15   ;;  %s160_s22 = sand.u32 1, %s876_s14  }
  0x30   : > { %s567_s27 = sshll.u32 %s160_s22, 6  ;;  %s568_s28 = sshll.u32 %s880_s15, 7 }
  0x31   : > { %s1026_s8 = scalar_lea.hbm %s1165_s1, %s568_s28  ;;  %s162_s29 = scalar_lea.vmem [#allocation5], %s567_s27 }
  0x32   : > { %s168_s9 = sshll.u32 %s162_s29, 4  ;;  %s1030_s11 = scalar_lea.sflag [#allocation6], %s158_s20  ;;  %s1028_s9 = int_to_ptr.vmem [resolvable:$true] %s168_s9 }
  0x33   : > { %s780_s17 = scalar_lea.hbm %s1026_s8, 1024  ;;  %p782_p6 = pneg %p1005_p7 }
  0x34   : > { %p781_p5 = scmp.ne.s32.totalorder %s1026_s8, %s780_s17  ;;  %s785_s22 = scalar_lea.hbm %s1165_s1, 2048 }
  0x35   : > { %p786_p3 = scmp.lt.s32.totalorder %s1026_s8, %s1165_s1  ;;  %p787_p4 = scmp.lt.s32.totalorder %s785_s22, %s780_s17 }
  0x36   : > { %p783_p12 = pnand %p782_p6, %p781_p5 }
  0x37   : > { %p788_p2 = por %p787_p4, %p786_p3 }
  0x38   : > { %p784_p0 = pneg %p783_p12 }
  0x3a   : > { %p789_p8 = pnand %p788_p2, %p784_p0 }
  0x3c   : > { %792 = shalt.err (!%p789_p8)
}
  0x3d   : > { %s793_s20 = scalar_lea.vmem %s1028_s9, 1024  ;;  %s886_s27 = smov [#allocation5]  }
  0x3e   : > { %p794_p9 = scmp.ne.s32.totalorder %s1028_s9, %s793_s20  ;;  %s798_s5 = sshll.u32 %s886_s27, 4  ;;  %s799_s5 = int_to_ptr.vmem [resolvable:$false] %s798_s5 }
  0x3f   : > { %s800_s29 = scalar_lea.vmem %s799_s5, 2048  ;;  %p801_p5 = scmp.lt.s32.totalorder %s1028_s9, %s799_s5 }
  0x40   : > { %p796_p10 = pnand %p794_p9, %p782_p6  ;;  %p802_p12 = scmp.lt.s32.totalorder %s800_s29, %s793_s20 }
  0x42   : > { %p797_p1 = pneg %p796_p10  ;;  %p803_p11 = por %p802_p12, %p801_p5 }
  0x44   : > { %p804_p13 = pnand %p803_p11, %p797_p1 }
  0x46   : > { %807 = shalt.err (!%p804_p13)
}
  0x47   : > { %s887_s17 = smov 256   ;;  %p1179_p6 = scmp.ne.s32.totalorder %s1176_s26, 0 }
  0x48   : > { %663 = dma.hbm_to_vmem [thread:$0]  (!%p1005_p7), %s1026_s8, 1024, %s1028_s9, %s1030_s11, %s887_s17, %s884_s6, %s885_s7  }
  0x49   : > { %180 = sbr.rel (%p1179_p6) target bundleno = 618 (0x26a), region = 32  ;;  %p1180_p0 = scmp.eq.s32.totalorder (!%p1179_p6), %s935_s16, 0 }
  0x4e   : > { %851 = dma.done.wait (%p1180_p0), [#allocation3], 384   ;;  %p1181_p3 = pmov %p1180_p0 }
  0x4f   : > { %s186_s4 = sand.u32 1, %s935_s16   ;;  %s1061_s10 = sand.u32 1, %s872_s13  }
  0x50   : > { %853 = vsyncadd (%p1181_p3), [#allocation3], 4294966912  ;;  %s571_s19 = sshll.u32 %s1061_s10, 6  ;;  %s187_s22 = scalar_lea.sflag [#allocation6], %s186_s4 }
  0x51   : > { %s1064_s28 = scalar_lea.vmem [#allocation5], %s571_s19  ;;  %p1182_p11 = scmp.ne.s32.totalorder %s1173_s23, 0 }
  0x53   : > { %855 = dma.done.wait (%p1182_p11), %s187_s22, 1024  }
  0x54   : > { %857 = vsyncadd (%p1182_p11), %s187_s22, 4294966272  ;;  %p1183_p13 = pmov %p1180_p0 }
  0x55   : > { %p1184_p7 = pmov %p1180_p0 }
  0x56   : > { %859 = dma.done.wait (%p1183_p13), [#allocation6], 384  }
  0x57   : > { %861 = vsyncadd (%p1184_p7), [#allocation6], 4294966912  ;;  %v888_v0 = vmov 0.0   ;;  %vm889_vm0 = vmmov 0   ;;  %vm324_vm1 = vcmask 138240   ;;  %vm331_vm2 = vcmask 131072  }
  0x58   : > { %600 = vmatprep.subr.mxu0 %v888_v0  ;;  %616 = vmatprep.mubr.msk.f32.mxu0 %vm889_vm0, %v888_v0  ;;  %v321_v1 = vld [vmem:[#allocation7] sm:$0xff]  ;;  %v323_v2 = vld [vmem:[#allocation7 + $0x10] sm:$0x1]  ;;  %v322_v3 = vld [vmem:[#allocation7 + $0x8] sm:$0xff]  ;;  %vm228_vm3 = vcmask 523264   ;;  %vm368_vm4 = vcmask 1040384  }
  0x59   : > { %625 = vmatprep.subr.mxu1 %v888_v0  ;;  %631 = vmatprep.mubr.msk.f32.mxu1 %vm889_vm0, %v888_v0  ;;  %v325_v4 = vsel %vm324_vm1, %v321_v1, -inf  ;;  %v332_v5 = vsel %vm331_vm2, %v323_v2, -inf  ;;  %v227_v6 = vld [vmem:[%s1064_s28 + $0x38] sm:$0xff]  ;;  %v226_v7 = vld [vmem:[%s1064_s28 + $0x30] sm:$0xff]  ;;  %v328_v8 = vsel %vm324_vm1, %v322_v3, -inf  ;;  %v225_v9 = vld [vmem:[%s1064_s28 + $0x28] sm:$0xff] }
  0x5a   : > { %326 = vmax.xlane.f32.xlu0 %v325_v4  ;;  %333 = vmax.xlane.f32.xlu1 %v332_v5  ;;  %v224_v10 = vld [vmem:[%s1064_s28 + $0x20] sm:$0xff]  ;;  %v223_v11 = vld [vmem:[%s1064_s28 + $0x18] sm:$0xff]  ;;  %v222_v12 = vld [vmem:[%s1064_s28 + $0x10] sm:$0xff]  ;;  %s640_s23 = smul.u32 24, %s1061_s10  ;;  %s580_s7 = sshll.u32 %s935_s16, 7 }
  0x5b   : > { %601 = vmatpush3.msra.mxu0 %v227_v6  ;;  %v221_v13 = vld [vmem:[%s1064_s28 + $0x8] sm:$0xff]  ;;  %v220_v14 = vld [vmem:[%s1064_s28] sm:$0xff]  ;;  %v218_v16 = vld [vmem:[#allocation2 + $0x8] sm:$0xff]  ;;  %s1121_s11 = scalar_lea.hbm %s1167_s3, %s580_s7  ;;  %s456_s30 = scalar_lea.sflag [#allocation4], %s1061_s10 }
  0x5c   : > { %602 = vmatprep.subr.mxu0 %v888_v0  ;;  %v217_v15 = vld [vmem:[#allocation2] sm:$0xff]  ;;  %v219_v17 = vld [vmem:[#allocation2 + $0x10] sm:$0x1]  ;;  %s216_s26 = scalar_lea.vmem [#allocation8], %s640_s23  ;;  %p1185_p2 = scmp.ne.s32.totalorder %s1174_s24, 0 }
  0x5d   : > { %603 = vmatpush3.msra.mxu0 %v226_v7  ;;  %s468_s6 = sshll.u32 %s216_s26, 4  ;;  %s890_s16 = smov [#allocation8]   ;;  %s1116_s6 = int_to_ptr.vmem [resolvable:$true] %s468_s6 }
  0x5e   : > { %329 = vmax.xlane.f32.xlu0 %v328_v8  ;;  %604 = vmatprep.subr.mxu0 %v888_v0  ;;  %s808_s20 = scalar_lea.vmem %s1116_s6, 384  ;;  %s812_s27 = sshll.u32 %s890_s16, 4  ;;  %s813_s27 = int_to_ptr.vmem [resolvable:$false] %s812_s27 }
  0x5f   : > { %605 = vmatpush3.msra.mxu0 %v225_v9  ;;  %p809_p4 = scmp.ne.s32.totalorder %s1116_s6, %s808_s20  ;;  %s814_s5 = scalar_lea.vmem %s813_s27, 768 }
  0x60   : > { %606 = vmatprep.subr.mxu0 %v888_v0  ;;  %p815_p10 = scmp.lt.s32.totalorder %s1116_s6, %s813_s27  ;;  %p816_p1 = scmp.lt.s32.totalorder %s814_s5, %s808_s20 }
  0x61   : > { %607 = vmatpush3.msra.mxu0 %v224_v10  ;;  %p810_p8 = pnand %p809_p4, %p1185_p2 }
  0x62   : > { %608 = vmatprep.subr.mxu0 %v888_v0  ;;  %p817_p5 = por %p816_p1, %p815_p10 }
  0x63   : > { %609 = vmatpush3.msra.mxu0 %v223_v11  ;;  %p811_p9 = pneg %p810_p8 }
  0x64   : > { %610 = vmatprep.subr.mxu0 %v888_v0 }
  0x65   : > { %611 = vmatpush3.msra.mxu0 %v222_v12  ;;  %p818_p12 = pnand %p817_p5, %p811_p9 }
  0x66   : > { %612 = vmatprep.subr.mxu0 %v888_v0 }
  0x67   : > { %613 = vmatpush3.msra.mxu0 %v221_v13 }
  0x68   : > { %614 = vmatprep.subr.mxu0 %v888_v0 }
  0x69   : > { %615 = vmatpush3.msra.mxu0 %v220_v14 }
  0x6a   : > { %617 = vmatmul.mubr.msk.f32.vlgmr.msra.gmra.mxu0 %vm228_vm3, %v217_v15 }
  0x6b   : > { %619 = vmatprep.mubr.msk.f32.mxu0 %vm889_vm0, %v888_v0 }
  0x6e   : > { %620 = vmatmul.mubr.msk.f32.gmra.mxu0 %vm228_vm3, %v218_v16 }
  0x6f   : > { %622 = vmatprep.mubr.msk.f32.mxu0 %vm889_vm0, %v888_v0 }
  0x72   : > { %623 = vmatmul.mubr.msk.f32.gmra.mxu0 %vm228_vm3, %v219_v17 }
  0xe3   : > { %v327_v18 = vpop.xlane.xlu0 %326  ;;  %v334_v19 = vpop.xlane.xlu1 %333 }
  0xe4   : > { %v335_v20 = vsub.f32 %v321_v1, %v327_v18  ;;  %v337_v21 = vsub.f32 %v323_v2, %v334_v19 }
  0xe6   : > { %v338_v22 = vmul.f32 1.442695, %v335_v20  ;;  %v342_v23 = vmul.f32 1.442695, %v337_v21 }
  0xe7   : > { %v330_v24 = vpop.xlane.xlu0 %329 }
  0xe8   : > { %716 = vpow2.f32 %v338_v22  ;;  %v336_v25 = vsub.f32 %v322_v3, %v330_v24 }
  0xe9   : > { %718 = vpow2.f32 %v342_v23 }
  0xea   : > { %v340_v26 = vmul.f32 1.442695, %v336_v25 }
  0xec   : > { %720 = vpow2.f32 %v340_v26 }
  0xf5   : > { %v717_v27 = vpop.eup %716 }
  0xf6   : > { %v719_v28 = vpop.eup %718  ;;  %v344_v29 = vsel %vm324_vm1, %v717_v27, 0.0 }
  0xf7   : > { %345 = vadd.xlane.f32.xlu1 %v344_v29  ;;  %v350_v30 = vsel %vm331_vm2, %v719_v28, 0.0 }
  0xf9   : > { %v721_v31 = vpop.eup %720 }
  0xfa   : > { %v347_v32 = vsel %vm324_vm1, %v721_v31, 0.0 }
  0xfb   : > { %351 = vadd.xlane.f32.xlu1 %v350_v30  ;;  %348 = vadd.xlane.f32.xlu0 %v347_v32 }
 0x12a   : > { %v304_v33 = vpop.f32.mrf.mxu0 }
 0x12b   : > { %v318_v41 = vmax.f32 %v304_v33, 0.0 }
 0x12c   : > { %v618_v34 = vpop.f32.mrf.mxu0 }
 0x12e   : > { %v309_v35 = vpop.f32.mrf.mxu0 }
 0x12f   : > { %v319_v38 = vmax.f32 %v309_v35, 0.0 }
 0x130   : > { %v621_v36 = vpop.f32.mrf.mxu0 }
 0x132   : > { %v314_v37 = vpop.f32.mrf.mxu0 }
 0x133   : > { %v320_v39 = vmax.f32 %v314_v37, 0.0 }
 0x134   : > { %v624_v40 = vpop.f32.mrf.mxu0 }
 0x135   : > { %626 = vmatpush3.msk.msra.mxu1 %vm368_vm4, %v320_v39 }
 0x136   : > { %627 = vmatprep.subr.mxu1 %v888_v0 }
 0x137   : > { %628 = vmatpush3.msra.mxu1 %v319_v38 }
 0x138   : > { %629 = vmatprep.subr.mxu1 %v888_v0 }
 0x139   : > { %630 = vmatpush3.msra.mxu1 %v318_v41 }
 0x180   : > { %v346_v42 = vpop.xlane.xlu1 %345 }
 0x181   : > { %722 = vrcp.f32 %v346_v42 }
 0x184   : > { %v349_v43 = vpop.xlane.xlu0 %348  ;;  %v352_v44 = vpop.xlane.xlu1 %351 }
 0x185   : > { %724 = vrcp.f32 %v349_v43 }
 0x186   : > { %726 = vrcp.f32 %v352_v44 }
 0x18e   : > { %v723_v45 = vpop.eup %722 }
 0x18f   : > { %v356_v46 = vmul.f32 %v723_v45, %v717_v27 }
 0x191   : > { %632 = vmatmul.mubr.msk.f32.vlgmr.msra.gmra.mxu1 %vm324_vm1, %v356_v46 }
 0x192   : > { %634 = vmatprep.mubr.msk.f32.mxu1 %vm889_vm0, %v888_v0  ;;  %v725_v47 = vpop.eup %724 }
 0x193   : > { %v357_v48 = vmul.f32 %v725_v47, %v721_v31  ;;  %v727_v49 = vpop.eup %726 }
 0x194   : > { %v358_v50 = vmul.f32 %v727_v49, %v719_v28 }
 0x195   : > { %635 = vmatmul.mubr.msk.f32.gmra.mxu1 %vm324_vm1, %v357_v48 }
 0x196   : > { %637 = vmatprep.mubr.msk.f32.mxu1 %vm889_vm0, %v888_v0 }
 0x199   : > { %638 = vmatmul.mubr.msk.f32.gmra.mxu1 %vm324_vm1, %v358_v50 }
 0x251   : > { %v438_v51 = vpop.f32.mrf.mxu1 }
 0x252   : > { %452 = vst [vmem:[%s216_s26] sm:$0xff] %v438_v51 }
 0x253   : > { %v633_v52 = vpop.f32.mrf.mxu1 }
 0x255   : > { %v443_v53 = vpop.f32.mrf.mxu1 }
 0x256   : > { %453 = vst [vmem:[%s216_s26 + $0x8] sm:$0xff] %v443_v53 }
 0x257   : > { %v636_v54 = vpop.f32.mrf.mxu1 }
 0x259   : > { %v448_v55 = vpop.f32.mrf.mxu1 }
 0x25a   : > { %454 = vst [vmem:[%s216_s26 + $0x10] sm:$0x1] %v448_v55 }
 0x25b   : > { %v639_v56 = vpop.f32.mrf.mxu1 }
 0x25c   : > { %821 = shalt.err (!%p818_p12)
}
 0x25d   : > { %s822_s29 = scalar_lea.hbm %s1121_s11, 384  ;;  %s826_s19 = scalar_lea.hbm %s1167_s3, 768 }
 0x25e   : > { %p823_p6 = scmp.ne.s32.totalorder %s1121_s11, %s822_s29  ;;  %p827_p11 = scmp.lt.s32.totalorder %s1121_s11, %s1167_s3 }
 0x25f   : > { %p828_p13 = scmp.lt.s32.totalorder %s826_s19, %s822_s29 }
 0x260   : > { %p824_p0 = pnand %p823_p6, %p1185_p2 }
 0x261   : > { %p829_p7 = por %p828_p13, %p827_p11 }
 0x262   : > { %p825_p3 = pneg %p824_p0 }
 0x264   : > { %p830_p4 = pnand %p829_p7, %p825_p3 }
 0x266   : > { %833 = shalt.err (!%p830_p4)
}
 0x267   : > { %s891_s23 = smov 128   ;;  %s892_s26 = smov 256  }
 0x268   : > { %s893_s7 = smov 8  }
 0x269   : > { %651 = dma.vmem_to_hbm [thread:$0]  (%p1185_p2), %s1116_s6, 384, %s1121_s11, %s456_s30, %s891_s23, %s892_s26, %s893_s7  }
 0x26a PF: > { %s483_s8 = sand.u32 1, %s868_s12   ;;  %p1186_p8 = scmp.ne.s32.totalorder %s1175_s25, 0 }
 0x26b   : > { %p1187_p9 = scmp.ge.s32.totalorder %s880_s15, 2  ;;  %s484_s9 = scalar_lea.sflag [#allocation4], %s483_s8 }
 0x26d   : > { %p665_p10 = pnand %p1187_p9, %p1186_p8 }
 0x26f   : > { %p666_p1 = pneg %p665_p10 }
 0x271   : > { %863 = dma.done.wait (%p666_p1), %s484_s9, 384  }
 0x272   : > { %865 = vsyncadd (%p666_p1), %s484_s9, 4294966912  ;;  %p17_p5 = scmp.ge.s32.totalorder %s939_s18, 4   ;;  %s1188_s12 = smov %s872_s13 }
 0x273   : > { %s1189_s13 = smov %s876_s14  ;;  %s1190_s14 = smov %s951_s21 }
 0x274   : > { %s1191_s15 = smov %s939_s18  ;;  %19 = sbr.rel (!%p17_p5) target bundleno = 6 (0x6), region = 86 }
 0x279   :  { %489 = vsyncpa [#allocation3], 1 }
 0x27a   :  { %491 = vsyncpa [#allocation3 + $0x1], 1 }
 0x27b   :  { %492 = vsyncpa [#allocation6], 1 }
 0x27c   :  { %494 = vsyncpa [#allocation6 + $0x1], 1 }
 0x27d   :  { %495 = vsyncpa [#allocation4], 1 }
 0x27e   :  { %497 = vsyncpa [#allocation4 + $0x1], 1 }

</bundles_post_ra>
